<compile_context>
chip_gen: v7x
topology: tpu7x:2x2x1
jax: 0.10.0
libtpu: 0.0.40
codegen_flags: <defaults>
</compile_context>

<pallas_src>
import functools

import jax
import jax.numpy as jnp
from jax.experimental import pallas as pl
from jax.experimental.pallas import tpu as pltpu

_BP = 8  # padded batch rows = one sublane tile


def _round8(n):
    return ((n + 7) // 8) * 8


def _lstm_kernel(x_ref, p_ref, y_ref, *, seq_len, input_size, hidden):
    """Whole LSTM recurrence + output projection, resident in VMEM.

    x_ref : (T*8, D)       time-major slab, row = t*8 + b (batch zero-padded to 8)
    p_ref : (rows, LANES)  fused parameter slab, 8-row-aligned sections:
                             [0:D]            Wx   (cell-gate cols pre-scaled by 2)
                             [8:8+H]          Wh   (cell-gate cols pre-scaled by 2)
                             [8+rH : +1]      b    (cell-gate cols pre-scaled by 2)
                             [.. : ..+H]      Wo   (lane-padded to LANES)
                             [.. : ..+1]      bo   (lane-padded to LANES)
    y_ref : (8, LANES)     lane-dense output slab (first B rows / out cols valid)
    """
    H = hidden
    D = input_size
    BP = _BP

    o_wx = 0
    o_wh = o_wx + _round8(D)
    o_b = o_wh + _round8(H)
    o_wo = o_b + 8
    o_bo = o_wo + _round8(H)

    wx = p_ref[o_wx:o_wx + D, :]     # (D, LANES)
    wh = p_ref[o_wh:o_wh + H, :]     # (H, LANES)
    b = p_ref[o_b:o_b + 1, :]        # (1, LANES)
    wo = p_ref[o_wo:o_wo + H, :]     # (H, LANES)
    bo = p_ref[o_bo:o_bo + 1, :]     # (1, LANES)

    # Hoisted input projection: one MXU op over all T*8 rows, off the serial
    # recurrence critical path.  xz is (T*8, LANES) = 8 vregs at the toy size.
    xz = jnp.dot(x_ref[...], wx, preferred_element_type=jnp.float32) + b

    h = jnp.zeros((BP, H), jnp.float32)
    c = jnp.zeros((BP, H), jnp.float32)

    # seq_len is small and static: full unroll keeps every slice static.
    for t in range(seq_len):
        # Only h @ Wh remains inside the serial chain; the xz slice starts at a
        # multiple of 8 sublanes, so it is a free static view.
        z = xz[t * BP:(t + 1) * BP, :] + jnp.dot(
            h, wh, preferred_element_type=jnp.float32)
        # Single full-width EUP pass; cell-gate columns were pre-scaled by 2 so
        # tanh(x) = 2*sigmoid(2x) - 1 is recovered with cheap VPU ops.
        s = jax.nn.sigmoid(z)                       # (BP, LANES)
        f = s[:, 0 * H:1 * H]
        i = s[:, 1 * H:2 * H]
        g = 2.0 * s[:, 2 * H:3 * H] - 1.0           # == tanh(pre-activation)
        o = s[:, 3 * H:4 * H]
        c = f * c + i * g
        h = o * jnp.tanh(c)

    # Lane-dense store: full (8, LANES) slab; wrapper slices valid rows/cols.
    y = jnp.dot(h, wo, preferred_element_type=jnp.float32) + bo
    y_ref[...] = y.astype(y_ref.dtype)


@jax.jit
def simple_lstm_forward(x, wx, wh, b, wo, bo):
    """x: (batch, seq, input_size) -> y: (batch, output_size)."""
    batch, seq_len, input_size = x.shape
    hidden = wh.shape[0]
    out_size = wo.shape[1]

    BP = _BP
    assert batch <= BP, "this toy-size kernel keeps the whole batch in one tile"
    lanes = 128 * (-(-max(4 * hidden, out_size) // 128))   # lane-dense width

    # Pre-scale the cell-gate columns by 2 (exact in f32) so the kernel needs a
    # single sigmoid pass per step: tanh(x) = 2*sigmoid(2x) - 1.
    def scale_g(w):
        return w.at[:, 2 * hidden:3 * hidden].multiply(2.0)

    def pad_to(a, rows, cols):
        r, c = a.shape
        return jnp.pad(a, ((0, rows - r), (0, cols - c)))

    # Fused, 8-row-aligned, lane-padded parameter slab -> one DMA.
    slab = jnp.concatenate([
        pad_to(scale_g(wx), _round8(input_size), lanes),
        pad_to(scale_g(wh), _round8(hidden), lanes),
        pad_to(scale_g(b), 8, lanes),
        pad_to(wo, _round8(hidden), lanes),
        pad_to(bo, 8, lanes),
    ], axis=0)

    # Time-major slab with the batch zero-padded to 8 rows: row = t*8 + b.
    x_tm = jnp.transpose(x, (1, 0, 2))                       # (T, B, D)
    x_tm = jnp.pad(x_tm, ((0, 0), (0, BP - batch), (0, 0)))  # (T, 8, D)
    x_slab = x_tm.reshape(seq_len * BP, input_size)          # (T*8, D)

    kernel = functools.partial(_lstm_kernel, seq_len=seq_len,
                               input_size=input_size, hidden=hidden)

    vmem = pl.BlockSpec(memory_space=pltpu.MemorySpace.VMEM)
    y_pad = pl.pallas_call(
        kernel,
        out_shape=jax.ShapeDtypeStruct((BP, lanes), jnp.float32),
        in_specs=[vmem, vmem],
        out_specs=vmem,
    )(x_slab, slab)
    return y_pad[:batch, :out_size]


def init_params(key, input_size, hidden_size, output_size):
    """Deterministic Xavier-uniform init matching SimpleLSTM.init_weights."""
    concat = input_size + hidden_size

    def xavier(k, fan_out, fan_in):
        bound = jnp.sqrt(6.0 / (fan_in + fan_out))
        # PyTorch weight shape is (out_features, in_features)
        return jax.random.uniform(k, (fan_out, fan_in), jnp.float32, -bound, bound)

    kf, ki, kg, ko, kout = jax.random.split(key, 5)
    w_f = xavier(kf, hidden_size, concat)
    w_i = xavier(ki, hidden_size, concat)
    w_g = xavier(kg, hidden_size, concat)
    w_o = xavier(ko, hidden_size, concat)
    w_out = xavier(kout, output_size, hidden_size)

    # Split each gate weight into x-part and h-part, transpose to (in, out),
    # then fuse the four gates along the output axis: order [f, i, g, o].
    def split(w):
        return w[:, :input_size].T, w[:, input_size:].T  # (D,H), (H,H)

    wx_f, wh_f = split(w_f)
    wx_i, wh_i = split(w_i)
    wx_g, wh_g = split(w_g)
    wx_o, wh_o = split(w_o)

    wx = jnp.concatenate([wx_f, wx_i, wx_g, wx_o], axis=1)  # (D, 4H)
    wh = jnp.concatenate([wh_f, wh_i, wh_g, wh_o], axis=1)  # (H, 4H)

    b = jnp.concatenate(
        [jnp.ones((hidden_size,), jnp.float32),      # forget gate bias = 1.0
         jnp.zeros((3 * hidden_size,), jnp.float32)]
    ).reshape(1, 4 * hidden_size)

    wo = w_out.T                                      # (H, O)
    bo = jnp.zeros((1, output_size), jnp.float32)
    return wx, wh, b, wo, bo


def reference_forward(x, wx, wh, b, wo, bo):
    """Pure-JAX reference mirroring the PyTorch loop semantics (f32-accurate)."""
    hi = jax.lax.Precision.HIGHEST
    batch, seq_len, _ = x.shape
    hidden = wh.shape[0]
    h = jnp.zeros((batch, hidden), jnp.float32)
    c = jnp.zeros((batch, hidden), jnp.float32)
    for t in range(seq_len):
        z = (jnp.dot(x[:, t, :], wx, precision=hi)
             + jnp.dot(h, wh, precision=hi) + b)
        f = jax.nn.sigmoid(z[:, 0 * hidden:1 * hidden])
        i = jax.nn.sigmoid(z[:, 1 * hidden:2 * hidden])
        g = jnp.tanh(z[:, 2 * hidden:3 * hidden])
        o = jax.nn.sigmoid(z[:, 3 * hidden:4 * hidden])
        c = f * c + i * g
        h = o * jnp.tanh(c)
    return jnp.dot(h, wo, precision=hi) + bo


if __name__ == "__main__":
    batch, seq_len = 2, 8
    input_size, hidden_size, output_size = 4, 32, 8

    key = jax.random.PRNGKey(0)
    k_x, k_p = jax.random.split(key)

    x = jax.random.normal(k_x, (batch, seq_len, input_size), jnp.float32)
    wx, wh, b, wo, bo = init_params(k_p, input_size, hidden_size, output_size)

    y = simple_lstm_forward(x, wx, wh, b, wo, bo)
    y = jax.block_until_ready(y)

    y_ref = reference_forward(x, wx, wh, b, wo, bo)
    assert y.shape == (batch, output_size)
    # Tolerance slightly above the strict-f32 level: the tanh-via-sigmoid
    # identity (2*sigmoid(2x)-1) introduces a few-ulp rounding difference per
    # step that accumulates through the 8-step recurrence.
    assert jnp.allclose(y, y_ref, atol=5e-5, rtol=5e-5), \
        "Pallas kernel mismatch vs reference"

    print("KERNEL_OK")
</pallas_src>

<mosaic_0001>
module attributes {stable_mosaic.version = 11 : i64} {
  func.func @_lstm_kernel(%arg0: memref<64x4xf32, #tpu.memory_space<vmem>>, %arg1: memref<88x128xf32, #tpu.memory_space<vmem>>, %arg2: memref<8x128xf32, #tpu.memory_space<vmem>>) attributes {dimension_semantics = [], scalar_prefetch = 0 : i64, scratch_operands = 0 : i64, tpu.core_type = #tpu.core_type<tc>} {
    %c0 = arith.constant 0 : index
    %c0_0 = arith.constant 0 : index
    %0 = vector.load %arg1[%c0, %c0_0] : memref<88x128xf32, #tpu.memory_space<vmem>>, vector<4x128xf32>
    %c8 = arith.constant 8 : index
    %c0_1 = arith.constant 0 : index
    %1 = vector.load %arg1[%c8, %c0_1] : memref<88x128xf32, #tpu.memory_space<vmem>>, vector<32x128xf32>
    %c40 = arith.constant 40 : index
    %c0_2 = arith.constant 0 : index
    %2 = vector.load %arg1[%c40, %c0_2] : memref<88x128xf32, #tpu.memory_space<vmem>>, vector<1x128xf32>
    %c48 = arith.constant 48 : index
    %c0_3 = arith.constant 0 : index
    %3 = vector.load %arg1[%c48, %c0_3] : memref<88x128xf32, #tpu.memory_space<vmem>>, vector<32x128xf32>
    %c80 = arith.constant 80 : index
    %c0_4 = arith.constant 0 : index
    %4 = vector.load %arg1[%c80, %c0_4] : memref<88x128xf32, #tpu.memory_space<vmem>>, vector<1x128xf32>
    %c0_5 = arith.constant 0 : index
    %c0_6 = arith.constant 0 : index
    %5 = vector.load %arg0[%c0_5, %c0_6] : memref<64x4xf32, #tpu.memory_space<vmem>>, vector<64x4xf32>
    %cst = arith.constant dense<0.000000e+00> : vector<64x128xf32>
    %6 = tpu.matmul %5, %0, %cst {dimension_numbers = #tpu.dot_dimension_numbers<[1], [0], [0], [1], [0, 0, 1, 1], [], []>} : vector<64x4xf32>, vector<4x128xf32>, vector<64x128xf32> -> vector<64x128xf32>
    %7 = vector.broadcast %2 : vector<1x128xf32> to vector<64x128xf32>
    %8 = arith.addf %6, %7 : vector<64x128xf32>
    %cst_7 = arith.constant 0.000000e+00 : f32
    %9 = vector.broadcast %cst_7 : f32 to vector<8x32xf32>
    %cst_8 = arith.constant 0.000000e+00 : f32
    %10 = vector.broadcast %cst_8 : f32 to vector<8x32xf32>
    %11 = vector.extract_strided_slice %8 {offsets = [0, 0], sizes = [8, 128], strides = [1, 1]} : vector<64x128xf32> to vector<8x128xf32>
    %cst_9 = arith.constant dense<0.000000e+00> : vector<8x128xf32>
    %12 = tpu.matmul %9, %1, %cst_9 {dimension_numbers = #tpu.dot_dimension_numbers<[1], [0], [0], [1], [0, 0, 1, 1], [], []>} : vector<8x32xf32>, vector<32x128xf32>, vector<8x128xf32> -> vector<8x128xf32>
    %13 = arith.addf %11, %12 : vector<8x128xf32>
    %14 = arith.negf %13 : vector<8x128xf32>
    %15 = math.exp %14 : vector<8x128xf32>
    %cst_10 = arith.constant 1.000000e+00 : f32
    %16 = vector.broadcast %cst_10 : f32 to vector<8x128xf32>
    %17 = arith.addf %16, %15 : vector<8x128xf32>
    %18 = arith.divf %16, %17 : vector<8x128xf32>
    %19 = vector.extract_strided_slice %18 {offsets = [0, 0], sizes = [8, 32], strides = [1, 1]} : vector<8x128xf32> to vector<8x32xf32>
    %20 = vector.extract_strided_slice %18 {offsets = [0, 32], sizes = [8, 32], strides = [1, 1]} : vector<8x128xf32> to vector<8x32xf32>
    %21 = vector.extract_strided_slice %18 {offsets = [0, 64], sizes = [8, 32], strides = [1, 1]} : vector<8x128xf32> to vector<8x32xf32>
    %cst_11 = arith.constant 2.000000e+00 : f32
    %22 = vector.broadcast %cst_11 : f32 to vector<8x32xf32>
    %23 = arith.mulf %22, %21 : vector<8x32xf32>
    %cst_12 = arith.constant 1.000000e+00 : f32
    %24 = vector.broadcast %cst_12 : f32 to vector<8x32xf32>
    %25 = arith.subf %23, %24 : vector<8x32xf32>
    %26 = vector.extract_strided_slice %18 {offsets = [0, 96], sizes = [8, 32], strides = [1, 1]} : vector<8x128xf32> to vector<8x32xf32>
    %27 = arith.mulf %19, %10 : vector<8x32xf32>
    %28 = arith.mulf %20, %25 : vector<8x32xf32>
    %29 = arith.addf %27, %28 : vector<8x32xf32>
    %30 = math.tanh %29 : vector<8x32xf32>
    %31 = arith.mulf %26, %30 : vector<8x32xf32>
    %32 = vector.extract_strided_slice %8 {offsets = [8, 0], sizes = [8, 128], strides = [1, 1]} : vector<64x128xf32> to vector<8x128xf32>
    %cst_13 = arith.constant dense<0.000000e+00> : vector<8x128xf32>
    %33 = tpu.matmul %31, %1, %cst_13 {dimension_numbers = #tpu.dot_dimension_numbers<[1], [0], [0], [1], [0, 0, 1, 1], [], []>} : vector<8x32xf32>, vector<32x128xf32>, vector<8x128xf32> -> vector<8x128xf32>
    %34 = arith.addf %32, %33 : vector<8x128xf32>
    %35 = arith.negf %34 : vector<8x128xf32>
    %36 = math.exp %35 : vector<8x128xf32>
    %cst_14 = arith.constant 1.000000e+00 : f32
    %37 = vector.broadcast %cst_14 : f32 to vector<8x128xf32>
    %38 = arith.addf %37, %36 : vector<8x128xf32>
    %39 = arith.divf %37, %38 : vector<8x128xf32>
    %40 = vector.extract_strided_slice %39 {offsets = [0, 0], sizes = [8, 32], strides = [1, 1]} : vector<8x128xf32> to vector<8x32xf32>
    %41 = vector.extract_strided_slice %39 {offsets = [0, 32], sizes = [8, 32], strides = [1, 1]} : vector<8x128xf32> to vector<8x32xf32>
    %42 = vector.extract_strided_slice %39 {offsets = [0, 64], sizes = [8, 32], strides = [1, 1]} : vector<8x128xf32> to vector<8x32xf32>
    %cst_15 = arith.constant 2.000000e+00 : f32
    %43 = vector.broadcast %cst_15 : f32 to vector<8x32xf32>
    %44 = arith.mulf %43, %42 : vector<8x32xf32>
    %cst_16 = arith.constant 1.000000e+00 : f32
    %45 = vector.broadcast %cst_16 : f32 to vector<8x32xf32>
    %46 = arith.subf %44, %45 : vector<8x32xf32>
    %47 = vector.extract_strided_slice %39 {offsets = [0, 96], sizes = [8, 32], strides = [1, 1]} : vector<8x128xf32> to vector<8x32xf32>
    %48 = arith.mulf %40, %29 : vector<8x32xf32>
    %49 = arith.mulf %41, %46 : vector<8x32xf32>
    %50 = arith.addf %48, %49 : vector<8x32xf32>
    %51 = math.tanh %50 : vector<8x32xf32>
    %52 = arith.mulf %47, %51 : vector<8x32xf32>
    %53 = vector.extract_strided_slice %8 {offsets = [16, 0], sizes = [8, 128], strides = [1, 1]} : vector<64x128xf32> to vector<8x128xf32>
    %cst_17 = arith.constant dense<0.000000e+00> : vector<8x128xf32>
    %54 = tpu.matmul %52, %1, %cst_17 {dimension_numbers = #tpu.dot_dimension_numbers<[1], [0], [0], [1], [0, 0, 1, 1], [], []>} : vector<8x32xf32>, vector<32x128xf32>, vector<8x128xf32> -> vector<8x128xf32>
    %55 = arith.addf %53, %54 : vector<8x128xf32>
    %56 = arith.negf %55 : vector<8x128xf32>
    %57 = math.exp %56 : vector<8x128xf32>
    %cst_18 = arith.constant 1.000000e+00 : f32
    %58 = vector.broadcast %cst_18 : f32 to vector<8x128xf32>
    %59 = arith.addf %58, %57 : vector<8x128xf32>
    %60 = arith.divf %58, %59 : vector<8x128xf32>
    %61 = vector.extract_strided_slice %60 {offsets = [0, 0], sizes = [8, 32], strides = [1, 1]} : vector<8x128xf32> to vector<8x32xf32>
    %62 = vector.extract_strided_slice %60 {offsets = [0, 32], sizes = [8, 32], strides = [1, 1]} : vector<8x128xf32> to vector<8x32xf32>
    %63 = vector.extract_strided_slice %60 {offsets = [0, 64], sizes = [8, 32], strides = [1, 1]} : vector<8x128xf32> to vector<8x32xf32>
    %cst_19 = arith.constant 2.000000e+00 : f32
    %64 = vector.broadcast %cst_19 : f32 to vector<8x32xf32>
    %65 = arith.mulf %64, %63 : vector<8x32xf32>
    %cst_20 = arith.constant 1.000000e+00 : f32
    %66 = vector.broadcast %cst_20 : f32 to vector<8x32xf32>
    %67 = arith.subf %65, %66 : vector<8x32xf32>
    %68 = vector.extract_strided_slice %60 {offsets = [0, 96], sizes = [8, 32], strides = [1, 1]} : vector<8x128xf32> to vector<8x32xf32>
    %69 = arith.mulf %61, %50 : vector<8x32xf32>
    %70 = arith.mulf %62, %67 : vector<8x32xf32>
    %71 = arith.addf %69, %70 : vector<8x32xf32>
    %72 = math.tanh %71 : vector<8x32xf32>
    %73 = arith.mulf %68, %72 : vector<8x32xf32>
    %74 = vector.extract_strided_slice %8 {offsets = [24, 0], sizes = [8, 128], strides = [1, 1]} : vector<64x128xf32> to vector<8x128xf32>
    %cst_21 = arith.constant dense<0.000000e+00> : vector<8x128xf32>
    %75 = tpu.matmul %73, %1, %cst_21 {dimension_numbers = #tpu.dot_dimension_numbers<[1], [0], [0], [1], [0, 0, 1, 1], [], []>} : vector<8x32xf32>, vector<32x128xf32>, vector<8x128xf32> -> vector<8x128xf32>
    %76 = arith.addf %74, %75 : vector<8x128xf32>
    %77 = arith.negf %76 : vector<8x128xf32>
    %78 = math.exp %77 : vector<8x128xf32>
    %cst_22 = arith.constant 1.000000e+00 : f32
    %79 = vector.broadcast %cst_22 : f32 to vector<8x128xf32>
    %80 = arith.addf %79, %78 : vector<8x128xf32>
    %81 = arith.divf %79, %80 : vector<8x128xf32>
    %82 = vector.extract_strided_slice %81 {offsets = [0, 0], sizes = [8, 32], strides = [1, 1]} : vector<8x128xf32> to vector<8x32xf32>
    %83 = vector.extract_strided_slice %81 {offsets = [0, 32], sizes = [8, 32], strides = [1, 1]} : vector<8x128xf32> to vector<8x32xf32>
    %84 = vector.extract_strided_slice %81 {offsets = [0, 64], sizes = [8, 32], strides = [1, 1]} : vector<8x128xf32> to vector<8x32xf32>
    %cst_23 = arith.constant 2.000000e+00 : f32
    %85 = vector.broadcast %cst_23 : f32 to vector<8x32xf32>
    %86 = arith.mulf %85, %84 : vector<8x32xf32>
    %cst_24 = arith.constant 1.000000e+00 : f32
    %87 = vector.broadcast %cst_24 : f32 to vector<8x32xf32>
    %88 = arith.subf %86, %87 : vector<8x32xf32>
    %89 = vector.extract_strided_slice %81 {offsets = [0, 96], sizes = [8, 32], strides = [1, 1]} : vector<8x128xf32> to vector<8x32xf32>
    %90 = arith.mulf %82, %71 : vector<8x32xf32>
    %91 = arith.mulf %83, %88 : vector<8x32xf32>
    %92 = arith.addf %90, %91 : vector<8x32xf32>
    %93 = math.tanh %92 : vector<8x32xf32>
    %94 = arith.mulf %89, %93 : vector<8x32xf32>
    %95 = vector.extract_strided_slice %8 {offsets = [32, 0], sizes = [8, 128], strides = [1, 1]} : vector<64x128xf32> to vector<8x128xf32>
    %cst_25 = arith.constant dense<0.000000e+00> : vector<8x128xf32>
    %96 = tpu.matmul %94, %1, %cst_25 {dimension_numbers = #tpu.dot_dimension_numbers<[1], [0], [0], [1], [0, 0, 1, 1], [], []>} : vector<8x32xf32>, vector<32x128xf32>, vector<8x128xf32> -> vector<8x128xf32>
    %97 = arith.addf %95, %96 : vector<8x128xf32>
    %98 = arith.negf %97 : vector<8x128xf32>
    %99 = math.exp %98 : vector<8x128xf32>
    %cst_26 = arith.constant 1.000000e+00 : f32
    %100 = vector.broadcast %cst_26 : f32 to vector<8x128xf32>
    %101 = arith.addf %100, %99 : vector<8x128xf32>
    %102 = arith.divf %100, %101 : vector<8x128xf32>
    %103 = vector.extract_strided_slice %102 {offsets = [0, 0], sizes = [8, 32], strides = [1, 1]} : vector<8x128xf32> to vector<8x32xf32>
    %104 = vector.extract_strided_slice %102 {offsets = [0, 32], sizes = [8, 32], strides = [1, 1]} : vector<8x128xf32> to vector<8x32xf32>
    %105 = vector.extract_strided_slice %102 {offsets = [0, 64], sizes = [8, 32], strides = [1, 1]} : vector<8x128xf32> to vector<8x32xf32>
    %cst_27 = arith.constant 2.000000e+00 : f32
    %106 = vector.broadcast %cst_27 : f32 to vector<8x32xf32>
    %107 = arith.mulf %106, %105 : vector<8x32xf32>
    %cst_28 = arith.constant 1.000000e+00 : f32
    %108 = vector.broadcast %cst_28 : f32 to vector<8x32xf32>
    %109 = arith.subf %107, %108 : vector<8x32xf32>
    %110 = vector.extract_strided_slice %102 {offsets = [0, 96], sizes = [8, 32], strides = [1, 1]} : vector<8x128xf32> to vector<8x32xf32>
    %111 = arith.mulf %103, %92 : vector<8x32xf32>
    %112 = arith.mulf %104, %109 : vector<8x32xf32>
    %113 = arith.addf %111, %112 : vector<8x32xf32>
    %114 = math.tanh %113 : vector<8x32xf32>
    %115 = arith.mulf %110, %114 : vector<8x32xf32>
    %116 = vector.extract_strided_slice %8 {offsets = [40, 0], sizes = [8, 128], strides = [1, 1]} : vector<64x128xf32> to vector<8x128xf32>
    %cst_29 = arith.constant dense<0.000000e+00> : vector<8x128xf32>
    %117 = tpu.matmul %115, %1, %cst_29 {dimension_numbers = #tpu.dot_dimension_numbers<[1], [0], [0], [1], [0, 0, 1, 1], [], []>} : vector<8x32xf32>, vector<32x128xf32>, vector<8x128xf32> -> vector<8x128xf32>
    %118 = arith.addf %116, %117 : vector<8x128xf32>
    %119 = arith.negf %118 : vector<8x128xf32>
    %120 = math.exp %119 : vector<8x128xf32>
    %cst_30 = arith.constant 1.000000e+00 : f32
    %121 = vector.broadcast %cst_30 : f32 to vector<8x128xf32>
    %122 = arith.addf %121, %120 : vector<8x128xf32>
    %123 = arith.divf %121, %122 : vector<8x128xf32>
    %124 = vector.extract_strided_slice %123 {offsets = [0, 0], sizes = [8, 32], strides = [1, 1]} : vector<8x128xf32> to vector<8x32xf32>
    %125 = vector.extract_strided_slice %123 {offsets = [0, 32], sizes = [8, 32], strides = [1, 1]} : vector<8x128xf32> to vector<8x32xf32>
    %126 = vector.extract_strided_slice %123 {offsets = [0, 64], sizes = [8, 32], strides = [1, 1]} : vector<8x128xf32> to vector<8x32xf32>
    %cst_31 = arith.constant 2.000000e+00 : f32
    %127 = vector.broadcast %cst_31 : f32 to vector<8x32xf32>
    %128 = arith.mulf %127, %126 : vector<8x32xf32>
    %cst_32 = arith.constant 1.000000e+00 : f32
    %129 = vector.broadcast %cst_32 : f32 to vector<8x32xf32>
    %130 = arith.subf %128, %129 : vector<8x32xf32>
    %131 = vector.extract_strided_slice %123 {offsets = [0, 96], sizes = [8, 32], strides = [1, 1]} : vector<8x128xf32> to vector<8x32xf32>
    %132 = arith.mulf %124, %113 : vector<8x32xf32>
    %133 = arith.mulf %125, %130 : vector<8x32xf32>
    %134 = arith.addf %132, %133 : vector<8x32xf32>
    %135 = math.tanh %134 : vector<8x32xf32>
    %136 = arith.mulf %131, %135 : vector<8x32xf32>
    %137 = vector.extract_strided_slice %8 {offsets = [48, 0], sizes = [8, 128], strides = [1, 1]} : vector<64x128xf32> to vector<8x128xf32>
    %cst_33 = arith.constant dense<0.000000e+00> : vector<8x128xf32>
    %138 = tpu.matmul %136, %1, %cst_33 {dimension_numbers = #tpu.dot_dimension_numbers<[1], [0], [0], [1], [0, 0, 1, 1], [], []>} : vector<8x32xf32>, vector<32x128xf32>, vector<8x128xf32> -> vector<8x128xf32>
    %139 = arith.addf %137, %138 : vector<8x128xf32>
    %140 = arith.negf %139 : vector<8x128xf32>
    %141 = math.exp %140 : vector<8x128xf32>
    %cst_34 = arith.constant 1.000000e+00 : f32
    %142 = vector.broadcast %cst_34 : f32 to vector<8x128xf32>
    %143 = arith.addf %142, %141 : vector<8x128xf32>
    %144 = arith.divf %142, %143 : vector<8x128xf32>
    %145 = vector.extract_strided_slice %144 {offsets = [0, 0], sizes = [8, 32], strides = [1, 1]} : vector<8x128xf32> to vector<8x32xf32>
    %146 = vector.extract_strided_slice %144 {offsets = [0, 32], sizes = [8, 32], strides = [1, 1]} : vector<8x128xf32> to vector<8x32xf32>
    %147 = vector.extract_strided_slice %144 {offsets = [0, 64], sizes = [8, 32], strides = [1, 1]} : vector<8x128xf32> to vector<8x32xf32>
    %cst_35 = arith.constant 2.000000e+00 : f32
    %148 = vector.broadcast %cst_35 : f32 to vector<8x32xf32>
    %149 = arith.mulf %148, %147 : vector<8x32xf32>
    %cst_36 = arith.constant 1.000000e+00 : f32
    %150 = vector.broadcast %cst_36 : f32 to vector<8x32xf32>
    %151 = arith.subf %149, %150 : vector<8x32xf32>
    %152 = vector.extract_strided_slice %144 {offsets = [0, 96], sizes = [8, 32], strides = [1, 1]} : vector<8x128xf32> to vector<8x32xf32>
    %153 = arith.mulf %145, %134 : vector<8x32xf32>
    %154 = arith.mulf %146, %151 : vector<8x32xf32>
    %155 = arith.addf %153, %154 : vector<8x32xf32>
    %156 = math.tanh %155 : vector<8x32xf32>
    %157 = arith.mulf %152, %156 : vector<8x32xf32>
    %158 = vector.extract_strided_slice %8 {offsets = [56, 0], sizes = [8, 128], strides = [1, 1]} : vector<64x128xf32> to vector<8x128xf32>
    %cst_37 = arith.constant dense<0.000000e+00> : vector<8x128xf32>
    %159 = tpu.matmul %157, %1, %cst_37 {dimension_numbers = #tpu.dot_dimension_numbers<[1], [0], [0], [1], [0, 0, 1, 1], [], []>} : vector<8x32xf32>, vector<32x128xf32>, vector<8x128xf32> -> vector<8x128xf32>
    %160 = arith.addf %158, %159 : vector<8x128xf32>
    %161 = arith.negf %160 : vector<8x128xf32>
    %162 = math.exp %161 : vector<8x128xf32>
    %cst_38 = arith.constant 1.000000e+00 : f32
    %163 = vector.broadcast %cst_38 : f32 to vector<8x128xf32>
    %164 = arith.addf %163, %162 : vector<8x128xf32>
    %165 = arith.divf %163, %164 : vector<8x128xf32>
    %166 = vector.extract_strided_slice %165 {offsets = [0, 0], sizes = [8, 32], strides = [1, 1]} : vector<8x128xf32> to vector<8x32xf32>
    %167 = vector.extract_strided_slice %165 {offsets = [0, 32], sizes = [8, 32], strides = [1, 1]} : vector<8x128xf32> to vector<8x32xf32>
    %168 = vector.extract_strided_slice %165 {offsets = [0, 64], sizes = [8, 32], strides = [1, 1]} : vector<8x128xf32> to vector<8x32xf32>
    %cst_39 = arith.constant 2.000000e+00 : f32
    %169 = vector.broadcast %cst_39 : f32 to vector<8x32xf32>
    %170 = arith.mulf %169, %168 : vector<8x32xf32>
    %cst_40 = arith.constant 1.000000e+00 : f32
    %171 = vector.broadcast %cst_40 : f32 to vector<8x32xf32>
    %172 = arith.subf %170, %171 : vector<8x32xf32>
    %173 = vector.extract_strided_slice %165 {offsets = [0, 96], sizes = [8, 32], strides = [1, 1]} : vector<8x128xf32> to vector<8x32xf32>
    %174 = arith.mulf %166, %155 : vector<8x32xf32>
    %175 = arith.mulf %167, %172 : vector<8x32xf32>
    %176 = arith.addf %174, %175 : vector<8x32xf32>
    %177 = math.tanh %176 : vector<8x32xf32>
    %178 = arith.mulf %173, %177 : vector<8x32xf32>
    %cst_41 = arith.constant dense<0.000000e+00> : vector<8x128xf32>
    %179 = tpu.matmul %178, %3, %cst_41 {dimension_numbers = #tpu.dot_dimension_numbers<[1], [0], [0], [1], [0, 0, 1, 1], [], []>} : vector<8x32xf32>, vector<32x128xf32>, vector<8x128xf32> -> vector<8x128xf32>
    %180 = vector.broadcast %4 : vector<1x128xf32> to vector<8x128xf32>
    %181 = arith.addf %179, %180 : vector<8x128xf32>
    %c0_42 = arith.constant 0 : index
    %c0_43 = arith.constant 0 : index
    %182 = vector.load %arg2[%c0_42, %c0_43] : memref<8x128xf32, #tpu.memory_space<vmem>>, vector<8x128xf32>
    tpu.vector_store %arg2[%c0_42, %c0_43], %181 {strides = array<i32>} : memref<8x128xf32, #tpu.memory_space<vmem>>, vector<8x128xf32>,
    return
  }
}

</mosaic_0001>

<bundles_post_ra>
// kernel: simple_lstm_forward.1
= control target key start
LH: loop header
LB: loop body
LE: loop exit
PB: predicated region body
PF: predicated region fallthrough
CT: control target
= control target key end

     0   :  { %vm59_vm0 = vcmask 1043456   ;;  %vm34_vm1 = vcmask 31744   ;;  %v1368_v0 = vmov 0.0|0.0   ;;  %vm1369_vm2 = vmmov 0   ;;  %s1371_s25 = smov 96   ;;  %s1372_s26 = smov 32   ;;  %s1577_s1 = inlined_call_operand.vmem [shape: f32[88,128], index: 1, kind: input, shape index: {}]   ;;  %s1578_s0 = inlined_call_operand.vmem [shape: f32[64,4], index: 0, kind: input, shape index: {}]   ;;  %s1579_s2 = inlined_call_operand.vmem [shape: f32[8,128], index: 2, kind: output, shape index: {}]  }
   0x1   :  { %1261 = vmatprep.subr.bf16.mxu1 %v1368_v0  ;;  %v12_v1 = vld [vmem:[%s1577_s1 + $0x8] sm:$0xff]  ;;  %v13_v2 = vld [vmem:[%s1577_s1 + $0x10] sm:$0xff]  ;;  %v11_v3 = vld [vmem:[%s1577_s1] sm:$0xf]  ;;  %v1370_v8 = vmov 0.0   ;;  %vm168_vm3 = vcmask 261120  }
   0x2   :  { %v1398_v4 = vpack.c.bf16 %v13_v2, %v12_v1  ;;  %1148 = vmatprep.subr.msk.mxu0 %vm59_vm0, %v11_v3  ;;  %v22_v5 = vld [vmem:[%s1578_s0] sm:$0xff]  ;;  %v23_v6 = vld [vmem:[%s1578_s0 + $0x8] sm:$0xff]  ;;  %v14_v7 = vld [vmem:[%s1577_s1 + $0x18] sm:$0xff]  ;;  %1170 = vmatprep.mubr.msk.f32.mxu1 %vm1369_vm2, %v1370_v8 }
   0x3   :  { %1149 = vmatpush3.msk.msra.mxu0 %vm59_vm0, %v11_v3  ;;  %1150 = vmatprep.mubr.msk.f32.mxu0 %vm34_vm1, %v22_v5  ;;  %v15_v9 = vld [vmem:[%s1577_s1 + $0x20] sm:$0xff]  ;;  %v1439_v12 = vld [vmem:[%s1577_s1 + $0x28] ss:$0 sm:$0xff]  ;;  %v24_v48 = vld [vmem:[%s1578_s0 + $0x10] sm:$0xff] }
   0x4   :  { %1263 = vmatpush3.bf16.msra.mxu1 %v1398_v4  ;;  %1151 = vmatmul.mubr.msk.f32.vlgmr.msra.gmra.mrb[0].mxu0 %vm34_vm1, %v23_v6  ;;  %v1419_v10 = vpack.c.bf16 %v15_v9, %v14_v7  ;;  %v25_v49 = vld [vmem:[%s1578_s0 + $0x18] sm:$0xff]  ;;  %v26_v50 = vld [vmem:[%s1578_s0 + $0x20] sm:$0xff]  ;;  %v27_v51 = vld [vmem:[%s1578_s0 + $0x28] sm:$0xff] }
   0x5   :  { %1264 = vmatprep.subr.bf16.mxu1 %v1368_v0  ;;  %1273 = vmatprep.subr.bf16.mxu0 %v1368_v0  ;;  %v28_v52 = vld [vmem:[%s1578_s0 + $0x30] sm:$0xff]  ;;  %v29_v53 = vld [vmem:[%s1578_s0 + $0x38] sm:$0xff] }
   0x6   :  { %1275 = vmatpush3.bf16.msra.mxu0 %v1398_v4  ;;  %1153 = vmatprep.mubr.msk.f32.mxu0 %vm34_vm1, %v24_v48 }
   0x7   :  { %1276 = vmatprep.subr.bf16.mxu0 %v1368_v0 }
   0x8   :  { %1266 = vmatpush3.bf16.msra.mxu1 %v1419_v10  ;;  %1154 = vmatmul.mubr.msk.f32.gmra.mrb[2].mxu0 %vm34_vm1, %v25_v49 }
   0x9   :  { %1267 = vmatprep.subr.bf16.mxu1 %v1368_v0  ;;  %1156 = vmatprep.mubr.msk.f32.mxu0 %vm34_vm1, %v26_v50 }
   0xa   :  { %1278 = vmatpush3.bf16.msra.mxu0 %v1419_v10 }
   0xb   :  { %1171 = vmatmul.mubr.f32.vlgmr.msra.gmra.mrb[0].mxu1 %v1370_v8  ;;  %1285 = vmatprep.subr.bf16.mxu0 %v1368_v0 }
   0xc   :  { %1269 = vmatpush3.bf16.msra.mxu1 %v1398_v4  ;;  %1181 = vmatprep.mubr.msk.f32.mxu1 %vm1369_vm2, %v1370_v8 }
   0xd   :  { %1270 = vmatprep.subr.bf16.mxu1 %v1368_v0  ;;  %1157 = vmatmul.mubr.msk.f32.gmra.mrb[4].mxu0 %vm34_vm1, %v27_v51 }
   0xe   :  { %1159 = vmatprep.mubr.msk.f32.mxu0 %vm34_vm1, %v28_v52 }
  0x10   :  { %1272 = vmatpush3.bf16.msra.mxu1 %v1419_v10 }
  0x11   :  { %1279 = vmatprep.subr.bf16.mxu1 %v1368_v0  ;;  %1160 = vmatmul.mubr.msk.f32.gmra.mrb[6].mxu0 %vm34_vm1, %v29_v53 }
  0x12   :  { %1192 = vmatprep.mubr.msk.f32.mxu0 %vm1369_vm2, %v1370_v8 }
  0xd7   :  { %v1152_v11 = vpop.f32.mrb[0].mxu0 }
  0xd8   :  { %v129_v13 = vpop.f32.mrb[1].mxu0  ;;  %v135_v33 = vadd.f32 %v1152_v11, %v1439_v12 }
  0xd9   :  { %v130_v14 = vadd.f32 %v1439_v12, %v129_v13 }
  0xdb   :  { %v1155_v57 = vpop.f32.mrb[2].mxu0 }
  0xdc   :  { %v139_v58 = vpop.f32.mrb[3].mxu0 }
  0xdd   :  { %v140_v1 = vadd.f32 %v1439_v12, %v139_v58 }
  0xde   :  { %v238_v15 = vpop.f32.mrb[0].mxu1 }
  0xdf   :  { %v242_v16 = vadd.f32 %v238_v15, %v130_v14  ;;  %v1172_v17 = vpop.f32.mrb[1].mxu1 }
  0xe0   :  { %v1484_v59 = vpop.f32.mrb[4].mxu0 }
  0xe1   :  { %v1069_v18 = vmul.f32 -1.442695, %v242_v16  ;;  %v1486_v60 = vpop.f32.mrb[5].mxu0 }
  0xe3   :  { %1320 = vpow2.f32 %v1069_v18 }
  0xe4   :  { %v1488_v61 = vpop.f32.mrb[6].mxu0 }
  0xe5   :  { %v1490_v62 = vpop.f32.mrb[7].mxu0 }
  0xed   :  { %v1321_v19 = vpop.eup %1320 }
  0xee   :  { %v246_v20 = vadd.f32 1.0, %v1321_v19 }
  0xf0   :  { %1322 = vrcp.f32 %v246_v20 }
  0xfa   :  { %v1323_v21 = vpop.eup %1322 }
  0xfb   :  { %v249_v22 = vmul.f32 2.0, %v1323_v21  ;;  %v251_v26 = vmul.f32 0.0, %v1323_v21 }
  0xfd   :  { %v1070_v23 = vadd.f32 -1.0, %v249_v22 }
  0xff   :  { %253 = vrot.lane.b32.xlu0 %v1070_v23, %s1371_s25 }
 0x171   :  { %v254_v24 = vpop.permute.xlu0 %253 }
 0x172   :  { %v256_v25 = vmul.f32 %v1323_v21, %v254_v24  ;;  %v145_v24 = vadd.f32 %v1155_v57, %v1439_v12 }
 0x174   :  { %258 = vrot.lane.b32.xlu0 %v256_v25, %s1371_s25 }
 0x1e6   :  { %v259_v27 = vpop.permute.xlu0 %258 }
 0x1e7   :  { %v261_v28 = vadd.f32 %v259_v27, %v251_v26 }
 0x1e9   :  { %1324 = vtanh.f32 %v261_v28 }
 0x1f3   :  { %v1325_v29 = vpop.eup %1324 }
 0x1f4   :  { %264 = vrot.lane.b32.xlu1 %v1325_v29, %s1371_s25 }
 0x266   :  { %v265_v30 = vpop.permute.xlu1 %264 }
 0x267   :  { %v267_v31 = vmul.f32 %v1323_v21, %v265_v30 }
 0x269   :  { %269 = vrot.lane.b32.xlu1 %v267_v31, %s1372_s26 }
 0x2db   :  { %v270_v32 = vpop.permute.xlu1 %269 }
 0x2dc   :  { %1182 = vmatmul.mubr.msk.f32.vlgmr.msra.gmra.mrb[2].mxu1 %vm168_vm3, %v270_v32 }
 0x2dd   :  { %1281 = vmatpush3.bf16.msra.mxu1 %v1398_v4  ;;  %1203 = vmatprep.mubr.msk.f32.mxu1 %vm1369_vm2, %v1370_v8 }
 0x2de   :  { %1282 = vmatprep.subr.bf16.mxu1 %v1368_v0 }
 0x2e1   :  { %1284 = vmatpush3.bf16.msra.mxu1 %v1419_v10 }
 0x2e2   :  { %1291 = vmatprep.subr.bf16.mxu1 %v1368_v0 }
 0x3af   :  { %v339_v34 = vpop.f32.mrb[2].mxu1 }
 0x3b0   :  { %v343_v35 = vadd.f32 %v339_v34, %v135_v33  ;;  %v1183_v36 = vpop.f32.mrb[3].mxu1 }
 0x3b2   :  { %v1072_v37 = vmul.f32 -1.442695, %v343_v35 }
 0x3b4   :  { %1326 = vpow2.f32 %v1072_v37 }
 0x3be   :  { %v1327_v38 = vpop.eup %1326 }
 0x3bf   :  { %v347_v39 = vadd.f32 1.0, %v1327_v38 }
 0x3c1   :  { %1328 = vrcp.f32 %v347_v39 }
 0x3cb   :  { %v1329_v40 = vpop.eup %1328 }
 0x3cc   :  { %v350_v41 = vmul.f32 2.0, %v1329_v40  ;;  %v352_v45 = vmul.f32 %v1329_v40, %v261_v28 }
 0x3ce   :  { %v1073_v42 = vadd.f32 -1.0, %v350_v41 }
 0x3d0   :  { %354 = vrot.lane.b32.xlu0 %v1073_v42, %s1371_s25 }
 0x442   :  { %v355_v43 = vpop.permute.xlu0 %354 }
 0x443   :  { %v357_v44 = vmul.f32 %v1329_v40, %v355_v43  ;;  %v150_v43 = vadd.f32 %v1439_v12, %v1486_v60 }
 0x445   :  { %359 = vrot.lane.b32.xlu1 %v357_v44, %s1371_s25 }
 0x4b7   :  { %v360_v46 = vpop.permute.xlu1 %359 }
 0x4b8   :  { %v362_v47 = vadd.f32 %v360_v46, %v352_v45 }
 0x4ba   :  { %1330 = vtanh.f32 %v362_v47 }
 0x4c4   :  { %v1331_v54 = vpop.eup %1330 }
 0x4c5   :  { %365 = vrot.lane.b32.xlu0 %v1331_v54, %s1371_s25 }
 0x537   :  { %v366_v55 = vpop.permute.xlu0 %365 }
 0x538   :  { %v368_v56 = vmul.f32 %v1329_v40, %v366_v55 }
 0x53a   :  { %370 = vrot.lane.b32.xlu1 %v368_v56, %s1372_s26 }
 0x5ac   :  { %v371_v63 = vpop.permute.xlu1 %370 }
 0x5ad   :  { %1193 = vmatmul.mubr.msk.f32.vlgmr.msra.gmra.mrb[8].mxu0 %vm168_vm3, %v371_v63 }
 0x5ae   :  { %1287 = vmatpush3.bf16.msra.mxu0 %v1398_v4  ;;  %1214 = vmatprep.mubr.msk.f32.mxu0 %vm1369_vm2, %v1370_v8 }
 0x5af   :  { %1288 = vmatprep.subr.bf16.mxu0 %v1368_v0 }
 0x5b2   :  { %1290 = vmatpush3.bf16.msra.mxu0 %v1419_v10 }
 0x5b3   :  { %1297 = vmatprep.subr.bf16.mxu0 %v1368_v0 }
 0x680   :  { %v440_v2 = vpop.f32.mrb[8].mxu0 }
 0x681   :  { %v444_v3 = vadd.f32 %v440_v2, %v140_v1  ;;  %v1194_v5 = vpop.f32.mrb[9].mxu0  ;;  %v155_v2 = vadd.f32 %v1484_v59, %v1439_v12 }
 0x683   :  { %v1075_v6 = vmul.f32 -1.442695, %v444_v3 }
 0x685   :  { %1332 = vpow2.f32 %v1075_v6 }
 0x68f   :  { %v1333_v7 = vpop.eup %1332 }
 0x690   :  { %v448_v9 = vadd.f32 1.0, %v1333_v7 }
 0x692   :  { %1334 = vrcp.f32 %v448_v9 }
 0x69c   :  { %v1335_v11 = vpop.eup %1334 }
 0x69d   :  { %v451_v13 = vmul.f32 2.0, %v1335_v11  ;;  %v453_v17 = vmul.f32 %v1335_v11, %v362_v47 }
 0x69f   :  { %v1076_v14 = vadd.f32 -1.0, %v451_v13 }
 0x6a1   :  { %455 = vrot.lane.b32.xlu0 %v1076_v14, %s1371_s25 }
 0x713   :  { %v456_v15 = vpop.permute.xlu0 %455 }
 0x714   :  { %v458_v16 = vmul.f32 %v1335_v11, %v456_v15 }
 0x716   :  { %460 = vrot.lane.b32.xlu1 %v458_v16, %s1371_s25 }
 0x788   :  { %v461_v18 = vpop.permute.xlu1 %460 }
 0x789   :  { %v463_v19 = vadd.f32 %v461_v18, %v453_v17 }
 0x78b   :  { %1336 = vtanh.f32 %v463_v19 }
 0x795   :  { %v1337_v20 = vpop.eup %1336 }
 0x796   :  { %466 = vrot.lane.b32.xlu0 %v1337_v20, %s1371_s25 }
 0x808   :  { %v467_v21 = vpop.permute.xlu0 %466 }
 0x809   :  { %v469_v22 = vmul.f32 %v1335_v11, %v467_v21 }
 0x80b   :  { %471 = vrot.lane.b32.xlu1 %v469_v22, %s1372_s26  ;;  %v160_v22 = vadd.f32 %v1439_v12, %v1490_v62 }
 0x87d   :  { %v472_v23 = vpop.permute.xlu1 %471 }
 0x87e   :  { %1204 = vmatmul.mubr.msk.f32.vlgmr.msra.gmra.mrb[4].mxu1 %vm168_vm3, %v472_v23 }
 0x87f   :  { %1293 = vmatpush3.bf16.msra.mxu1 %v1398_v4  ;;  %1225 = vmatprep.mubr.msk.f32.mxu1 %vm1369_vm2, %v1370_v8 }
 0x880   :  { %1294 = vmatprep.subr.bf16.mxu1 %v1368_v0 }
 0x883   :  { %1296 = vmatpush3.bf16.msra.mxu1 %v1419_v10 }
 0x884   :  { %1303 = vmatprep.subr.bf16.mxu1 %v1368_v0 }
 0x951   :  { %v541_v25 = vpop.f32.mrb[4].mxu1 }
 0x952   :  { %v545_v26 = vadd.f32 %v541_v25, %v145_v24  ;;  %v1205_v27 = vpop.f32.mrb[5].mxu1 }
 0x954   :  { %v1078_v28 = vmul.f32 -1.442695, %v545_v26 }
 0x956   :  { %1338 = vpow2.f32 %v1078_v28 }
 0x960   :  { %v1339_v29 = vpop.eup %1338 }
 0x961   :  { %v549_v30 = vadd.f32 1.0, %v1339_v29 }
 0x963   :  { %1340 = vrcp.f32 %v549_v30 }
 0x96d   :  { %v1341_v31 = vpop.eup %1340 }
 0x96e   :  { %v552_v32 = vmul.f32 2.0, %v1341_v31  ;;  %v554_v36 = vmul.f32 %v1341_v31, %v463_v19 }
 0x970   :  { %v1079_v33 = vadd.f32 -1.0, %v552_v32 }
 0x972   :  { %556 = vrot.lane.b32.xlu0 %v1079_v33, %s1371_s25 }
 0x9e4   :  { %v557_v34 = vpop.permute.xlu0 %556 }
 0x9e5   :  { %v559_v35 = vmul.f32 %v1341_v31, %v557_v34 }
 0x9e7   :  { %561 = vrot.lane.b32.xlu1 %v559_v35, %s1371_s25 }
 0xa59   :  { %v562_v37 = vpop.permute.xlu1 %561 }
 0xa5a   :  { %v564_v38 = vadd.f32 %v562_v37, %v554_v36 }
 0xa5c   :  { %1342 = vtanh.f32 %v564_v38 }
 0xa66   :  { %v1343_v39 = vpop.eup %1342 }
 0xa67   :  { %567 = vrot.lane.b32.xlu0 %v1343_v39, %s1371_s25  ;;  %v165_v39 = vadd.f32 %v1488_v61, %v1439_v12  ;;  %v17_v61 = vld [vmem:[%s1577_s1 + $0x30] sm:$0xff] }
 0xad9   :  { %v568_v40 = vpop.permute.xlu0 %567 }
 0xada   :  { %v570_v41 = vmul.f32 %v1341_v31, %v568_v40 }
 0xadc   :  { %572 = vrot.lane.b32.xlu1 %v570_v41, %s1372_s26 }
 0xb4e   :  { %v573_v42 = vpop.permute.xlu1 %572 }
 0xb4f   :  { %1215 = vmatmul.mubr.msk.f32.vlgmr.msra.gmra.mrb[10].mxu0 %vm168_vm3, %v573_v42 }
 0xb50   :  { %1299 = vmatpush3.bf16.msra.mxu0 %v1398_v4  ;;  %1236 = vmatprep.mubr.msk.f32.mxu0 %vm1369_vm2, %v1370_v8 }
 0xb51   :  { %1300 = vmatprep.subr.bf16.mxu0 %v1368_v0 }
 0xb54   :  { %1302 = vmatpush3.bf16.msra.mxu0 %v1419_v10 }
 0xb55   :  { %1309 = vmatprep.subr.bf16.mxu0 %v1368_v0 }
 0xc22   :  { %v642_v44 = vpop.f32.mrb[10].mxu0 }
 0xc23   :  { %v646_v45 = vadd.f32 %v642_v44, %v150_v43  ;;  %v1216_v46 = vpop.f32.mrb[11].mxu0 }
 0xc25   :  { %v1081_v47 = vmul.f32 -1.442695, %v646_v45 }
 0xc27   :  { %1344 = vpow2.f32 %v1081_v47 }
 0xc31   :  { %v1345_v48 = vpop.eup %1344 }
 0xc32   :  { %v650_v49 = vadd.f32 1.0, %v1345_v48 }
 0xc34   :  { %1346 = vrcp.f32 %v650_v49 }
 0xc3e   :  { %v1347_v50 = vpop.eup %1346 }
 0xc3f   :  { %v653_v51 = vmul.f32 2.0, %v1347_v50  ;;  %v655_v55 = vmul.f32 %v1347_v50, %v564_v38 }
 0xc41   :  { %v1082_v52 = vadd.f32 -1.0, %v653_v51 }
 0xc43   :  { %657 = vrot.lane.b32.xlu0 %v1082_v52, %s1371_s25 }
 0xcb5   :  { %v658_v53 = vpop.permute.xlu0 %657 }
 0xcb6   :  { %v660_v54 = vmul.f32 %v1347_v50, %v658_v53  ;;  %v18_v53 = vld [vmem:[%s1577_s1 + $0x38] sm:$0xff] }
 0xcb8   :  { %662 = vrot.lane.b32.xlu1 %v660_v54, %s1371_s25  ;;  %v19_v54 = vld [vmem:[%s1577_s1 + $0x40] sm:$0xff] }
 0xd2a   :  { %v663_v56 = vpop.permute.xlu1 %662 }
 0xd2b   :  { %v665_v57 = vadd.f32 %v663_v56, %v655_v55  ;;  %v1310_v55 = vpack.c.bf16 %v18_v53, %v17_v61  ;;  %v20_v56 = vld [vmem:[%s1577_s1 + $0x48] sm:$0xff] }
 0xd2d   :  { %1348 = vtanh.f32 %v665_v57 }
 0xd37   :  { %v1349_v58 = vpop.eup %1348 }
 0xd38   :  { %668 = vrot.lane.b32.xlu0 %v1349_v58, %s1371_s25 }
 0xdaa   :  { %v669_v60 = vpop.permute.xlu0 %668 }
 0xdab   :  { %v671_v63 = vmul.f32 %v1347_v50, %v669_v60 }
 0xdad   :  { %673 = vrot.lane.b32.xlu1 %v671_v63, %s1372_s26 }
 0xe1f   :  { %v674_v1 = vpop.permute.xlu1 %673 }
 0xe20   :  { %1226 = vmatmul.mubr.msk.f32.vlgmr.msra.gmra.mrb[6].mxu1 %vm168_vm3, %v674_v1 }
 0xe21   :  { %1305 = vmatpush3.bf16.msra.mxu1 %v1398_v4  ;;  %1247 = vmatprep.mubr.msk.f32.mxu1 %vm1369_vm2, %v1370_v8 }
 0xe22   :  { %1306 = vmatprep.subr.bf16.mxu1 %v1368_v0 }
 0xe25   :  { %1308 = vmatpush3.bf16.msra.mxu1 %v1419_v10 }
 0xef3   :  { %v743_v3 = vpop.f32.mrb[6].mxu1 }
 0xef4   :  { %v747_v5 = vadd.f32 %v743_v3, %v155_v2  ;;  %v1227_v6 = vpop.f32.mrb[7].mxu1  ;;  %v1092_v2 = vld [vmem:[%s1577_s1 + $0x50] ss:$0 sm:$0xff] }
 0xef6   :  { %v1084_v7 = vmul.f32 -1.442695, %v747_v5 }
 0xef8   :  { %1350 = vpow2.f32 %v1084_v7 }
 0xf02   :  { %v1351_v9 = vpop.eup %1350 }
 0xf03   :  { %v751_v11 = vadd.f32 1.0, %v1351_v9 }
 0xf05   :  { %1352 = vrcp.f32 %v751_v11 }
 0xf0f   :  { %v1353_v13 = vpop.eup %1352 }
 0xf10   :  { %v754_v4 = vmul.f32 2.0, %v1353_v13  ;;  %v756_v10 = vmul.f32 %v1353_v13, %v665_v57  ;;  %v1313_v57 = vpack.c.bf16 %v20_v56, %v19_v54 }
 0xf12   :  { %v1085_v14 = vadd.f32 -1.0, %v754_v4 }
 0xf14   :  { %758 = vrot.lane.b32.xlu0 %v1085_v14, %s1371_s25 }
 0xf86   :  { %v759_v15 = vpop.permute.xlu0 %758 }
 0xf87   :  { %v761_v16 = vmul.f32 %v1353_v13, %v759_v15 }
 0xf89   :  { %763 = vrot.lane.b32.xlu1 %v761_v16, %s1371_s25 }
 0xffb   :  { %v764_v17 = vpop.permute.xlu1 %763 }
 0xffc   :  { %v766_v59 = vadd.f32 %v764_v17, %v756_v10 }
 0xffe   :  { %1354 = vtanh.f32 %v766_v59 }
0x1008   :  { %v1355_v18 = vpop.eup %1354 }
0x1009   :  { %769 = vrot.lane.b32.xlu0 %v1355_v18, %s1371_s25 }
0x107b   :  { %v770_v19 = vpop.permute.xlu0 %769 }
0x107c   :  { %v772_v20 = vmul.f32 %v1353_v13, %v770_v19 }
0x107e   :  { %774 = vrot.lane.b32.xlu1 %v772_v20, %s1372_s26 }
0x10f0   :  { %v775_v21 = vpop.permute.xlu1 %774 }
0x10f1   :  { %1237 = vmatmul.mubr.msk.f32.vlgmr.msra.gmra.mrb[12].mxu0 %vm168_vm3, %v775_v21 }
0x10f2   :  { %1258 = vmatprep.mubr.msk.f32.mxu0 %vm1369_vm2, %v1370_v8  ;;  %1311 = vmatpush3.bf16.msra.mxu0 %v1310_v55 }
0x10f3   :  { %1312 = vmatprep.subr.bf16.mxu0 %v1368_v0 }
0x10f6   :  { %1314 = vmatpush3.bf16.msra.mxu0 %v1313_v57 }
0x11c4   :  { %v844_v23 = vpop.f32.mrb[12].mxu0 }
0x11c5   :  { %v848_v24 = vadd.f32 %v844_v23, %v160_v22  ;;  %v1238_v25 = vpop.f32.mrb[13].mxu0 }
0x11c7   :  { %v1087_v26 = vmul.f32 -1.442695, %v848_v24 }
0x11c9   :  { %1356 = vpow2.f32 %v1087_v26 }
0x11d3   :  { %v1357_v27 = vpop.eup %1356 }
0x11d4   :  { %v852_v28 = vadd.f32 1.0, %v1357_v27 }
0x11d6   :  { %1358 = vrcp.f32 %v852_v28 }
0x11e0   :  { %v1359_v29 = vpop.eup %1358 }
0x11e1   :  { %v855_v30 = vmul.f32 2.0, %v1359_v29  ;;  %v857_v8 = vmul.f32 %v1359_v29, %v766_v59 }
0x11e3   :  { %v1088_v31 = vadd.f32 -1.0, %v855_v30 }
0x11e5   :  { %859 = vrot.lane.b32.xlu0 %v1088_v31, %s1371_s25 }
0x1257   :  { %v860_v32 = vpop.permute.xlu0 %859 }
0x1258   :  { %v862_v33 = vmul.f32 %v1359_v29, %v860_v32 }
0x125a   :  { %864 = vrot.lane.b32.xlu1 %v862_v33, %s1371_s25 }
0x12cc   :  { %v865_v34 = vpop.permute.xlu1 %864 }
0x12cd   :  { %v867_v62 = vadd.f32 %v865_v34, %v857_v8 }
0x12cf   :  { %1360 = vtanh.f32 %v867_v62 }
0x12d9   :  { %v1361_v35 = vpop.eup %1360 }
0x12da   :  { %870 = vrot.lane.b32.xlu0 %v1361_v35, %s1371_s25 }
0x134c   :  { %v871_v36 = vpop.permute.xlu0 %870 }
0x134d   :  { %v873_v37 = vmul.f32 %v1359_v29, %v871_v36 }
0x134f   :  { %875 = vrot.lane.b32.xlu1 %v873_v37, %s1372_s26 }
0x13c1   :  { %v876_v38 = vpop.permute.xlu1 %875 }
0x13c2   :  { %1248 = vmatmul.mubr.msk.f32.vlgmr.msra.gmra.mrb[8].mxu1 %vm168_vm3, %v876_v38 }
0x1495   :  { %v945_v40 = vpop.f32.mrb[8].mxu1 }
0x1496   :  { %v949_v41 = vadd.f32 %v945_v40, %v165_v39  ;;  %v1249_v42 = vpop.f32.mrb[9].mxu1 }
0x1498   :  { %v1090_v43 = vmul.f32 -1.442695, %v949_v41 }
0x149a   :  { %1362 = vpow2.f32 %v1090_v43 }
0x14a4   :  { %v1363_v44 = vpop.eup %1362 }
0x14a5   :  { %v953_v45 = vadd.f32 1.0, %v1363_v44 }
0x14a7   :  { %1364 = vrcp.f32 %v953_v45 }
0x14b1   :  { %v1365_v46 = vpop.eup %1364 }
0x14b2   :  { %v956_v47 = vmul.f32 2.0, %v1365_v46  ;;  %v958_v51 = vmul.f32 %v1365_v46, %v867_v62 }
0x14b4   :  { %v1091_v48 = vadd.f32 -1.0, %v956_v47 }
0x14b6   :  { %960 = vrot.lane.b32.xlu0 %v1091_v48, %s1371_s25 }
0x1528   :  { %v961_v49 = vpop.permute.xlu0 %960 }
0x1529   :  { %v963_v50 = vmul.f32 %v1365_v46, %v961_v49 }
0x152b   :  { %965 = vrot.lane.b32.xlu1 %v963_v50, %s1371_s25 }
0x159d   :  { %v966_v52 = vpop.permute.xlu1 %965 }
0x159e   :  { %v968_v12 = vadd.f32 %v966_v52, %v958_v51 }
0x15a0   :  { %1366 = vtanh.f32 %v968_v12 }
0x15aa   :  { %v1367_v58 = vpop.eup %1366 }
0x15ab   :  { %971 = vrot.lane.b32.xlu0 %v1367_v58, %s1371_s25 }
0x161d   :  { %v972_v60 = vpop.permute.xlu0 %971 }
0x161e   :  { %v974_v63 = vmul.f32 %v1365_v46, %v972_v60 }
0x1620   :  { %980 = vrot.lane.b32.xlu1 %v974_v63, %s1372_s26 }
0x1692   :  { %v981_v1 = vpop.permute.xlu1 %980 }
0x1693   :  { %1259 = vmatmul.mubr.msk.f32.vlgmr.msra.gmra.mrb[14].mxu0 %vm168_vm3, %v981_v1 }
0x1766   :  { %v1050_v3 = vpop.f32.mrb[14].mxu0 }
0x1767   :  { %v1051_v5 = vadd.f32 %v1092_v2, %v1050_v3  ;;  %v1260_v6 = vpop.f32.mrb[15].mxu0 }
0x1769   :  { %1054 = vst [vmem:[%s1579_s2] sm:$0xff] %v1051_v5 }

</bundles_post_ra>
